<compile_context>
chip_gen: v7x
topology: tpu7x:2x2x1
jax: 0.10.0
libtpu: 0.0.40
codegen_flags: <defaults>
</compile_context>

<pallas_src>
import functools

import jax
import jax.numpy as jnp
from jax import lax
from jax.experimental import pallas as pl
from jax.experimental.pallas import tpu as pltpu


N_WAY_PAD = 128  # lane-dense class axis inside the kernel


def _round_up(x, m):
    return ((x + m - 1) // m) * m


def protonet_kernel(labels_ref, support_ref, query_ref, out_ref):
    # labels_ref : [1, n_support]        int32   (VMEM resident)
    # support_ref: [n_support, D]        f32/bf16 (VMEM resident)
    # query_ref  : [tq, D]               f32/bf16 (tiled over the grid)
    # out_ref    : [tq, N_WAY_PAD]       f32      (tiled over the grid)
    labels = labels_ref[...]                       # [1, n_support]
    support = support_ref[...]                     # [n_support, D]
    query = query_ref[...]                         # [tq, D]

    n_support, d = support.shape
    n_way_pad = out_ref.shape[1]

    # One-hot class membership: [n_way_pad, n_support].
    class_ids = lax.broadcasted_iota(jnp.int32, (n_way_pad, n_support), 0)
    onehot = class_ids == labels
    mask = onehot.astype(support.dtype)

    # Per-class counts and prototype means (zero prototype for empty classes).
    counts = jnp.sum(onehot.astype(jnp.float32), axis=1, keepdims=True)   # [n_way_pad, 1]
    proto_sum = jnp.dot(mask, support,
                        preferred_element_type=jnp.float32)               # [n_way_pad, D]
    prototypes = jnp.where(counts > 0.0,
                           proto_sum / jnp.maximum(counts, 1.0),
                           0.0)                                           # f32 [n_way_pad, D]

    # ||q||^2 per query row: [tq, 1] (f32 VPU).
    q_f32 = query.astype(jnp.float32)
    q_sq = jnp.sum(q_f32 * q_f32, axis=1, keepdims=True)

    # ||p||^2 as a lane-dense row [1, n_way_pad] via a ones-row matmul
    # (avoids a column->row XLU transpose).
    ones_row = jnp.ones((1, d), dtype=jnp.float32)
    p_sq = lax.dot_general(ones_row, prototypes * prototypes,
                           dimension_numbers=(((1,), (1,)), ((), ())),
                           preferred_element_type=jnp.float32)            # [1, n_way_pad]

    # q . p^T without materializing prototypes.T (contract feature axis of both).
    qp = lax.dot_general(query, prototypes.astype(query.dtype),
                         dimension_numbers=(((1,), (1,)), ((), ())),
                         preferred_element_type=jnp.float32)              # [tq, n_way_pad]

    distances = q_sq + p_sq - 2.0 * qp
    distances = jnp.maximum(distances, 0.0)   # true squared distances are >= 0
    out_ref[...] = -distances


@functools.partial(jax.jit, static_argnames=("n_way",))
def protonet_logits(support_features, support_labels, query_features, n_way=5):
    """ProtoNet logits.

    support_features: [n_support, D], support_labels: [n_support] int,
    query_features: [n_query, D]. Returns logits [n_query, n_way] float32.
    """
    n_support, d = support_features.shape
    n_query = query_features.shape[0]

    if not jnp.issubdtype(support_features.dtype, jnp.floating):
        support_features = support_features.astype(jnp.float32)
    if not jnp.issubdtype(query_features.dtype, jnp.floating):
        query_features = query_features.astype(jnp.float32)

    # Query-tile size: sublane-aligned (multiple of 8), capped at 128 rows/step.
    tq = 128 if n_query >= 128 else _round_up(max(n_query, 1), 8)
    n_query_pad = _round_up(n_query, tq)
    if n_query_pad != n_query:
        query_features = jnp.pad(query_features,
                                 ((0, n_query_pad - n_query), (0, 0)))

    labels_2d = support_labels.astype(jnp.int32).reshape(1, n_support)

    grid = (n_query_pad // tq,)

    itemsize = jnp.dtype(support_features.dtype).itemsize
    cost = pl.CostEstimate(
        flops=2 * N_WAY_PAD * n_support * d * grid[0]
        + 2 * n_query_pad * N_WAY_PAD * d,
        transcendentals=0,
        bytes_accessed=itemsize * (n_support * d + n_query_pad * d)
        + 4 * n_query_pad * N_WAY_PAD
        + 4 * n_support,
    )

    logits_pad = pl.pallas_call(
        protonet_kernel,
        out_shape=jax.ShapeDtypeStruct((n_query_pad, N_WAY_PAD), jnp.float32),
        grid=grid,
        in_specs=[
            pl.BlockSpec((1, n_support), lambda i: (0, 0)),      # labels (resident)
            pl.BlockSpec((n_support, d), lambda i: (0, 0)),      # support (resident)
            pl.BlockSpec((tq, d), lambda i: (i, 0)),             # query tile
        ],
        out_specs=pl.BlockSpec((tq, N_WAY_PAD), lambda i: (i, 0)),
        compiler_params=pltpu.CompilerParams(
            dimension_semantics=("parallel",),
        ),
        cost_estimate=cost,
    )(labels_2d, support_features, query_features)

    return logits_pad[:n_query, :n_way]


def protonet_logits_ref(support_features, support_labels, query_features, n_way=5):
    """Pure-JAX reference mirroring the PyTorch module."""
    d = support_features.shape[1]
    protos = []
    for c in range(n_way):
        m = support_labels == c
        cnt = jnp.sum(m)
        p = jnp.where(
            cnt > 0,
            jnp.sum(jnp.where(m[:, None], support_features, 0.0), axis=0)
            / jnp.maximum(cnt, 1),
            jnp.zeros((d,), jnp.float32),
        )
        protos.append(p)
    protos = jnp.stack(protos)
    diff = query_features[:, None, :] - protos[None, :, :]
    return -jnp.sum(diff * diff, axis=2)


if __name__ == "__main__":
    feature_dim = 64
    n_way = 5
    n_support = 10   # 2 shots per class
    n_query = 8

    key = jax.random.PRNGKey(0)
    k_sup, k_qry = jax.random.split(key)

    support_features = jax.random.normal(k_sup, (n_support, feature_dim),
                                         dtype=jnp.float32)
    # Deterministic labels: two examples per class (0..4, 0..4).
    support_labels = jnp.array([0, 1, 2, 3, 4, 0, 1, 2, 3, 4], dtype=jnp.int32)
    query_features = jax.random.normal(k_qry, (n_query, feature_dim),
                                       dtype=jnp.float32)

    logits = protonet_logits(support_features, support_labels,
                             query_features, n_way=n_way)
    jax.block_until_ready(logits)

    ref = protonet_logits_ref(support_features, support_labels,
                              query_features, n_way=n_way)
    assert logits.shape == (n_query, n_way)
    assert jnp.allclose(logits, ref, atol=1e-3, rtol=1e-3), "mismatch vs reference"

    print("KERNEL_OK")
</pallas_src>

<mosaic_0001>
module attributes {stable_mosaic.version = 11 : i64} {
  func.func @protonet_kernel(%arg0: i32, %arg1: memref<1x10xi32, #tpu.memory_space<vmem>>, %arg2: memref<10x64xf32, #tpu.memory_space<vmem>>, %arg3: memref<8x64xf32, #tpu.memory_space<vmem>>, %arg4: memref<8x128xf32, #tpu.memory_space<vmem>>) attributes {dimension_semantics = [#tpu.dimension_semantics<parallel>], iteration_bounds = array<i64: 1>, scalar_prefetch = 0 : i64, scratch_operands = 0 : i64, tpu.core_type = #tpu.core_type<tc>, window_params = [{pipeline_mode = #tpu.pipeline_mode<synchronous>, transform_indices = @transform_0, window_bounds = array<i64: 1, 10>}, {pipeline_mode = #tpu.pipeline_mode<synchronous>, transform_indices = @transform_1, window_bounds = array<i64: 10, 64>}, {transform_indices = @transform_2, window_bounds = array<i64: 8, 64>}, {transform_indices = @transform_3, window_bounds = array<i64: 8, 128>}]} {
    %c0 = arith.constant 0 : index
    %c0_0 = arith.constant 0 : index
    %0 = vector.load %arg1[%c0, %c0_0] : memref<1x10xi32, #tpu.memory_space<vmem>>, vector<1x10xi32>
    %c0_1 = arith.constant 0 : index
    %c0_2 = arith.constant 0 : index
    %1 = vector.load %arg2[%c0_1, %c0_2] : memref<10x64xf32, #tpu.memory_space<vmem>>, vector<10x64xf32>
    %c0_3 = arith.constant 0 : index
    %c0_4 = arith.constant 0 : index
    %2 = vector.load %arg3[%c0_3, %c0_4] : memref<8x64xf32, #tpu.memory_space<vmem>>, vector<8x64xf32>
    %3 = tpu.iota {dimensions = array<i32: 0>} : vector<128x10xi32>
    %4 = vector.broadcast %0 : vector<1x10xi32> to vector<128x10xi32>
    %5 = arith.cmpi eq, %3, %4 : vector<128x10xi32>
    %6 = arith.extui %5 : vector<128x10xi1> to vector<128x10xi32>
    %7 = arith.sitofp %6 : vector<128x10xi32> to vector<128x10xf32>
    %8 = arith.extui %5 : vector<128x10xi1> to vector<128x10xi32>
    %9 = arith.sitofp %8 : vector<128x10xi32> to vector<128x10xf32>
    %cst = arith.constant dense<0.000000e+00> : vector<128xf32>
    %10 = vector.multi_reduction <add>, %9, %cst [1] : vector<128x10xf32> to vector<128xf32>
    %11 = vector.shape_cast %10 : vector<128xf32> to vector<128x1xf32>
    %cst_5 = arith.constant dense<0.000000e+00> : vector<128x64xf32>
    %12 = tpu.matmul %7, %1, %cst_5 {dimension_numbers = #tpu.dot_dimension_numbers<[1], [0], [0], [1], [0, 0, 1, 1], [], []>} : vector<128x10xf32>, vector<10x64xf32>, vector<128x64xf32> -> vector<128x64xf32>
    %cst_6 = arith.constant 0.000000e+00 : f32
    %13 = vector.broadcast %cst_6 : f32 to vector<128x1xf32>
    %14 = arith.cmpf ogt, %11, %13 : vector<128x1xf32>
    %cst_7 = arith.constant 1.000000e+00 : f32
    %15 = vector.broadcast %cst_7 : f32 to vector<128x1xf32>
    %16 = arith.maximumf %11, %15 : vector<128x1xf32>
    %17 = vector.broadcast %16 : vector<128x1xf32> to vector<128x64xf32>
    %18 = arith.divf %12, %17 : vector<128x64xf32>
    %cst_8 = arith.constant 0.000000e+00 : f32
    %19 = vector.shape_cast %14 : vector<128x1xi1> to vector<128x1xi1>
    %20 = vector.broadcast %19 : vector<128x1xi1> to vector<128x64xi1>
    %21 = vector.broadcast %cst_8 : f32 to vector<128x64xf32>
    %22 = arith.select %20, %18, %21 : vector<128x64xi1>, vector<128x64xf32>
    %23 = arith.mulf %2, %2 : vector<8x64xf32>
    %cst_9 = arith.constant dense<0.000000e+00> : vector<8xf32>
    %24 = vector.multi_reduction <add>, %23, %cst_9 [1] : vector<8x64xf32> to vector<8xf32>
    %25 = vector.shape_cast %24 : vector<8xf32> to vector<8x1xf32>
    %cst_10 = arith.constant 1.000000e+00 : f32
    %26 = vector.broadcast %cst_10 : f32 to vector<1x64xf32>
    %27 = arith.mulf %22, %22 : vector<128x64xf32>
    %cst_11 = arith.constant dense<0.000000e+00> : vector<1x128xf32>
    %28 = tpu.matmul %26, %27, %cst_11 {dimension_numbers = #tpu.dot_dimension_numbers<[1], [1], [0], [0], [0, 0, 1, 0], [], []>} : vector<1x64xf32>, vector<128x64xf32>, vector<1x128xf32> -> vector<1x128xf32>
    %cst_12 = arith.constant dense<0.000000e+00> : vector<8x128xf32>
    %29 = tpu.matmul %2, %22, %cst_12 {dimension_numbers = #tpu.dot_dimension_numbers<[1], [1], [0], [0], [0, 0, 1, 0], [], []>} : vector<8x64xf32>, vector<128x64xf32>, vector<8x128xf32> -> vector<8x128xf32>
    %30 = vector.broadcast %25 : vector<8x1xf32> to vector<8x128xf32>
    %31 = vector.broadcast %28 : vector<1x128xf32> to vector<8x128xf32>
    %32 = arith.addf %30, %31 : vector<8x128xf32>
    %cst_13 = arith.constant 2.000000e+00 : f32
    %33 = vector.broadcast %cst_13 : f32 to vector<8x128xf32>
    %34 = arith.mulf %33, %29 : vector<8x128xf32>
    %35 = arith.subf %32, %34 : vector<8x128xf32>
    %cst_14 = arith.constant 0.000000e+00 : f32
    %36 = vector.broadcast %cst_14 : f32 to vector<8x128xf32>
    %37 = arith.maximumf %35, %36 : vector<8x128xf32>
    %cst_15 = arith.constant 0.000000e+00 : f32
    %38 = vector.broadcast %cst_15 : f32 to vector<8x128xf32>
    %39 = arith.subf %38, %37 : vector<8x128xf32>
    %c0_16 = arith.constant 0 : index
    %c0_17 = arith.constant 0 : index
    %40 = vector.load %arg4[%c0_16, %c0_17] : memref<8x128xf32, #tpu.memory_space<vmem>>, vector<8x128xf32>
    tpu.vector_store %arg4[%c0_16, %c0_17], %39 {strides = array<i32>} : memref<8x128xf32, #tpu.memory_space<vmem>>, vector<8x128xf32>,
    return
  }
  func.func @transform_0(%arg0: i32) -> (i32, i32) {
    %c0_i32 = arith.constant 0 : i32
    %c0_i32_0 = arith.constant 0 : i32
    %c0_i32_1 = arith.constant 0 : i32
    return %c0_i32, %c0_i32_0 : i32, i32
  }
  func.func @transform_1(%arg0: i32) -> (i32, i32) {
    %c0_i32 = arith.constant 0 : i32
    %c0_i32_0 = arith.constant 0 : i32
    %c0_i32_1 = arith.constant 0 : i32
    return %c0_i32, %c0_i32_0 : i32, i32
  }
  func.func @transform_2(%arg0: i32) -> (i32, i32) {
    %c0_i32 = arith.constant 0 : i32
    %c0_i32_0 = arith.constant 0 : i32
    return %arg0, %c0_i32 : i32, i32
  }
  func.func @transform_3(%arg0: i32) -> (i32, i32) {
    %c0_i32 = arith.constant 0 : i32
    %c0_i32_0 = arith.constant 0 : i32
    return %arg0, %c0_i32 : i32, i32
  }
}

</mosaic_0001>

<bundles_post_ra>
// kernel: protonet_logits.1
= control target key start
LH: loop header
LB: loop body
LE: loop exit
PB: predicated region body
PF: predicated region fallthrough
CT: control target
= control target key end

     0   :  { %8 = vsyncpa [#allocation3], 0  ;;  %s1401_s0 = inlined_call_operand.vmem [shape: s32[1,10], index: 0, kind: input, shape index: {}]   ;;  %s1402_s1 = inlined_call_operand.hbm [shape: f32[10,64], index: 1, kind: input, shape index: {}]   ;;  %s1403_s2 = inlined_call_operand.vmem [shape: f32[8,64], index: 2, kind: input, shape index: {}]   ;;  %s1404_s3 = inlined_call_operand.hbm [shape: f32[8,128], index: 3, kind: output, shape index: {}]  }
   0x1   :  { %9 = vsyncpa [#allocation4], 0  ;;  %s1125_s12 = smov [#allocation2]   ;;  %s1077_s16 = scalar_lea.hbm %s1402_s1, 256 }
   0x2   :  { %s17_s13 = sshll.u32 %s1125_s12, 4  ;;  %p1078_p0 = scmp.ne.s32.totalorder %s1402_s1, %s1077_s16  ;;  %s18_s13 = int_to_ptr.vmem [resolvable:$true] %s17_s13 }
   0x3   :  { %p1081_p1 = scmp.lt.u32.totalorder %s1077_s16, %s1402_s1 }
   0x5   :  { %p1083_p2 = pnand %p1081_p1, %p1078_p0 }
   0x7   :  { %1086 = shalt.err (!%p1083_p2)
}
   0x8   :  { %s1087_s21 = scalar_lea.vmem %s18_s13, 256  ;;  %p1092_p4 = scmp.lt.s32.totalorder %s18_s13, %s18_s13 }
   0x9   :  { %p1088_p3 = scmp.ne.s32.totalorder %s18_s13, %s1087_s21  ;;  %p1093_p5 = scmp.lt.s32.totalorder %s1087_s21, %s1087_s21 }
   0xb   :  { %p1094_p6 = por %p1093_p5, %p1092_p4 }
   0xd   :  { %p1095_p7 = pnand %p1094_p6, %p1088_p3 }
   0xf   :  { %1098 = shalt.err (!%p1095_p7)
}
  0x10   :  { %s1126_s22 = smov 128   ;;  %s1127_s23 = smov 8  }
  0x11   :  { %23 = dma.hbm_to_vmem [thread:$0]  %s1402_s1, 256, %s18_s13, [#allocation3], %s1126_s22, %s1126_s22, %s1127_s23  }
  0x12   :  { %1121 = dma.done.wait [#allocation3], 256  }
  0x13   :  { %1122 = vsyncadd [#allocation3], 4294967040  ;;  %v33_v0 = vlaneseq  ;;  %vm199_vm0 = vcmask 1041408   ;;  %vm1128_vm1 = vmmov 1   ;;  %v1173_v4 = vld [vmem:[%s1401_s0] ss:$0 sm:$0xff] }
  0x14   :  { %vm967_vm2 = vmpackc.low %vm199_vm0, %vm1128_vm1  ;;  %v30_v5 = vld [vmem:[#allocation2] sm:$0xff]  ;;  %v31_v6 = vld [vmem:[#allocation2 + $0x8] sm:$0x3]  ;;  %vm102_vm3 = vcmask 80896   ;;  %v1129_v9 = vmov 0.0   ;;  %v1130_v54 = vmov 0.0|0.0  }
  0x15   :  { %v1166_v1 = vshrl.u32 %v33_v0, 7  ;;  %v966_v7 = vpack.c.bf16 %v31_v6, %v30_v5  ;;  %972 = vmatprep.subr.bf16.mxu1 %v1130_v54  ;;  %v1260_v55 = vld [vmem:[%s1403_s2] sm:$0xff]  ;;  %s1133_s2 = smov [#allocation5]  }
  0x16   :  { %v460_v56 = vmul.f32 %v1260_v55, %v1260_v55  ;;  %s739_s28 = sshll.u32 %s1133_s2, 4  ;;  %s740_s28 = int_to_ptr.vmem [resolvable:$true] %s739_s28 }
  0x17   :  { %v35_v2 = vadd.s32 8, %v1166_v1  ;;  %v36_v3 = vadd.s32 16, %v1166_v1  ;;  %vm54_vm4 = vcmp.eq.s32.totalorder %v1166_v1, %v1173_v4  ;;  %v37_v8 = vadd.s32 24, %v1166_v1  ;;  %968 = vmatprep.subr.msk.bf16.mxu0 %vm967_vm2, %v966_v7  ;;  %s1099_s29 = scalar_lea.vmem %s740_s28, 128  ;;  %p1104_p9 = scmp.lt.s32.totalorder %s740_s28, %s740_s28 }
  0x18   :  { %v749_v10 = vsel %vm54_vm4, 1.0, %v1129_v9  ;;  %v38_v11 = vadd.s32 32, %v1166_v1  ;;  %971 = vmatpush3.bf16.msk.msra.mxu0 %vm967_vm2, %v966_v7  ;;  %v39_v14 = vadd.s32 40, %v1166_v1  ;;  %v40_v15 = vadd.s32 48, %v1166_v1  ;;  %p1100_p8 = scmp.ne.s32.totalorder %s740_s28, %s1099_s29  ;;  %p1105_p10 = scmp.lt.s32.totalorder %s1099_s29, %s1099_s29 }
  0x19   :  { %vm55_vm5 = vcmp.eq.s32.totalorder %v35_v2, %v1173_v4  ;;  %vm56_vm6 = vcmp.eq.s32.totalorder %v36_v3, %v1173_v4  ;;  %872 = vmatprep.mubr.msk.f32.mxu0 %vm102_vm3, %v749_v10  ;;  %vm57_vm7 = vcmp.eq.s32.totalorder %v37_v8, %v1173_v4  ;;  %v103_v17 = vsel %vm102_vm3, %v749_v10, 0.0  ;;  %1004 = vmatprep.subr.bf16.mxu0 %v1130_v54 }
  0x1a   :  { %v750_v12 = vsel %vm55_vm5, 1.0, %v1129_v9  ;;  %v751_v13 = vsel %vm56_vm6, 1.0, %v1129_v9  ;;  %vm58_vm8 = vcmp.eq.s32.totalorder %v38_v11, %v1173_v4  ;;  %v752_v16 = vsel %vm57_vm7, 1.0, %v1129_v9  ;;  %104 = vadd.xlane.f32.xlu0 %v103_v17  ;;  %p1106_p11 = por %p1105_p10, %p1104_p9 }
  0x1b   :  { %873 = vmatmul.mubr.msk.f32.vlgmr.msra.gmra.mrb[0].mxu0 %vm102_vm3, %v750_v12  ;;  %v753_v18 = vsel %vm58_vm8, 1.0, %v1129_v9  ;;  %vm59_vm9 = vcmp.eq.s32.totalorder %v39_v14, %v1173_v4  ;;  %v41_v19 = vadd.s32 56, %v1166_v1  ;;  %v109_v20 = vsel %vm102_vm3, %v751_v13, 0.0 }
  0x1c   :  { %875 = vmatprep.mubr.msk.f32.mxu0 %vm102_vm3, %v751_v13  ;;  %vm60_vm10 = vcmp.eq.s32.totalorder %v40_v15, %v1173_v4  ;;  %v42_v21 = vadd.s32 64, %v1166_v1  ;;  %110 = vadd.xlane.f32.xlu1 %v109_v20  ;;  %v106_v22 = vsel %vm102_vm3, %v750_v12, 0.0  ;;  %v112_v23 = vsel %vm102_vm3, %v752_v16, 0.0  ;;  %p1107_p12 = pnand %p1106_p11, %p1100_p8 }
  0x1d   :  { %v754_v24 = vsel %vm59_vm9, 1.0, %v1129_v9  ;;  %v755_v25 = vsel %vm60_vm10, 1.0, %v1129_v9  ;;  %vm61_vm11 = vcmp.eq.s32.totalorder %v41_v19, %v1173_v4  ;;  %v43_v26 = vadd.s32 72, %v1166_v1 }
  0x1e   :  { %107 = vadd.xlane.f32.xlu0 %v106_v22  ;;  %vm62_vm12 = vcmp.eq.s32.totalorder %v42_v21, %v1173_v4  ;;  %v44_v27 = vadd.s32 80, %v1166_v1  ;;  %v115_v28 = vsel %vm102_vm3, %v753_v18, 0.0  ;;  %v118_v29 = vsel %vm102_vm3, %v754_v24, 0.0 }
  0x1f   :  { %876 = vmatmul.mubr.msk.f32.gmra.mrb[2].mxu0 %vm102_vm3, %v752_v16  ;;  %v756_v30 = vsel %vm61_vm11, 1.0, %v1129_v9  ;;  %v757_v31 = vsel %vm62_vm12, 1.0, %v1129_v9  ;;  %vm63_vm13 = vcmp.eq.s32.totalorder %v43_v26, %v1173_v4  ;;  %v45_v32 = vadd.s32 88, %v1166_v1 }
  0x20   :  { %878 = vmatprep.mubr.msk.f32.mxu0 %vm102_vm3, %v753_v18  ;;  %113 = vadd.xlane.f32.xlu1 %v112_v23  ;;  %vm64_vm14 = vcmp.eq.s32.totalorder %v44_v27, %v1173_v4  ;;  %v46_v33 = vadd.s32 96, %v1166_v1  ;;  %v121_v34 = vsel %vm102_vm3, %v755_v25, 0.0  ;;  %v124_v35 = vsel %vm102_vm3, %v756_v30, 0.0 }
  0x21   :  { %v758_v36 = vsel %vm63_vm13, 1.0, %v1129_v9  ;;  %v759_v37 = vsel %vm64_vm14, 1.0, %v1129_v9  ;;  %vm65_vm15 = vcmp.eq.s32.totalorder %v45_v32, %v1173_v4  ;;  %v47_v38 = vadd.s32 104, %v1166_v1 }
  0x22   :  { %116 = vadd.xlane.f32.xlu0 %v115_v28  ;;  %vm66_vm0 = vcmp.eq.s32.totalorder %v46_v33, %v1173_v4  ;;  %v48_v39 = vadd.s32 112, %v1166_v1  ;;  %v127_v40 = vsel %vm102_vm3, %v757_v31, 0.0  ;;  %v130_v41 = vsel %vm102_vm3, %v758_v36, 0.0 }
  0x23   :  { %879 = vmatmul.mubr.msk.f32.gmra.mrb[4].mxu0 %vm102_vm3, %v754_v24  ;;  %v760_v42 = vsel %vm65_vm15, 1.0, %v1129_v9  ;;  %v761_v43 = vsel %vm66_vm0, 1.0, %v1129_v9  ;;  %vm67_vm1 = vcmp.eq.s32.totalorder %v47_v38, %v1173_v4  ;;  %v49_v44 = vadd.s32 120, %v1166_v1 }
  0x24   :  { %881 = vmatprep.mubr.msk.f32.mxu0 %vm102_vm3, %v755_v25  ;;  %119 = vadd.xlane.f32.xlu1 %v118_v29  ;;  %vm68_vm2 = vcmp.eq.s32.totalorder %v48_v39, %v1173_v4  ;;  %v133_v45 = vsel %vm102_vm3, %v759_v37, 0.0  ;;  %v136_v46 = vsel %vm102_vm3, %v760_v42, 0.0  ;;  %v762_v47 = vsel %vm67_vm1, 1.0, %v1129_v9 }
  0x25   :  { %v763_v48 = vsel %vm68_vm2, 1.0, %v1129_v9  ;;  %vm69_vm4 = vcmp.eq.s32.totalorder %v49_v44, %v1173_v4  ;;  %v139_v49 = vsel %vm102_vm3, %v761_v43, 0.0  ;;  %v142_v50 = vsel %vm102_vm3, %v762_v47, 0.0 }
  0x26   :  { %122 = vadd.xlane.f32.xlu0 %v121_v34  ;;  %v764_v51 = vsel %vm69_vm4, 1.0, %v1129_v9  ;;  %v145_v52 = vsel %vm102_vm3, %v763_v48, 0.0  ;;  %vm1131_vm5 = vmmov 0  }
  0x27   :  { %882 = vmatmul.mubr.msk.f32.gmra.mrb[6].mxu0 %vm102_vm3, %v756_v30  ;;  %v148_v53 = vsel %vm102_vm3, %v764_v51, 0.0  ;;  %928 = vmatprep.mubr.msk.f32.mxu1 %vm1131_vm5, %v1129_v9 }
  0x28   :  { %884 = vmatprep.mubr.msk.f32.mxu0 %vm102_vm3, %v757_v31  ;;  %125 = vadd.xlane.f32.xlu1 %v124_v35 }
  0x2a   :  { %128 = vadd.xlane.f32.xlu0 %v127_v40 }
  0x2b   :  { %885 = vmatmul.mubr.msk.f32.gmra.mrb[8].mxu0 %vm102_vm3, %v758_v36 }
  0x2c   :  { %887 = vmatprep.mubr.msk.f32.mxu0 %vm102_vm3, %v759_v37  ;;  %131 = vadd.xlane.f32.xlu1 %v130_v41 }
  0x2e   :  { %134 = vadd.xlane.f32.xlu0 %v133_v45 }
  0x2f   :  { %888 = vmatmul.mubr.msk.f32.gmra.mrb[10].mxu0 %vm102_vm3, %v760_v42 }
  0x30   :  { %890 = vmatprep.mubr.msk.f32.mxu0 %vm102_vm3, %v761_v43  ;;  %137 = vadd.xlane.f32.xlu1 %v136_v46 }
  0x32   :  { %140 = vadd.xlane.f32.xlu0 %v139_v49 }
  0x33   :  { %891 = vmatmul.mubr.msk.f32.gmra.mrb[12].mxu0 %vm102_vm3, %v762_v47 }
  0x34   :  { %893 = vmatprep.mubr.msk.f32.mxu0 %vm102_vm3, %v763_v48  ;;  %143 = vadd.xlane.f32.xlu1 %v142_v50 }
  0x36   :  { %146 = vadd.xlane.f32.xlu0 %v145_v52 }
  0x37   :  { %894 = vmatmul.mubr.msk.f32.gmra.mrb[14].mxu0 %vm102_vm3, %v764_v51  ;;  %vm461_vm3 = vcmask 523264  }
  0x38   :  { %149 = vadd.xlane.f32.xlu1 %v148_v53  ;;  %963 = vmatprep.mubr.msk.f32.mxu0 %vm1131_vm5, %v1129_v9  ;;  %v462_v57 = vsel %vm461_vm3, %v460_v56, 0.0  ;;  %vm1292_vm8 = vmpackc.low %vm461_vm3, %vm461_vm3 }
  0x3a   :  { %463 = vadd.xlane.f32.xlu0 %v462_v57 }
  0xa7   :  { %v105_v58 = vpop.xlane.xlu0 %104 }
  0xa8   :  { %v364_v0 = vmax.f32 %v105_v58, 1.0  ;;  %vm348_vm7 = vcmp.gt.f32.partialorder %v105_v58, 0.0 }
  0xa9   :  { %v1265_v59 = vpop.xlane.xlu1 %110 }
  0xaa   :  { %v366_v4 = vmax.f32 %v1265_v59, 1.0  ;;  %vm350_vm10 = vcmp.gt.f32.partialorder %v1265_v59, 0.0 }
  0xab   :  { %v108_v60 = vpop.xlane.xlu0 %107 }
  0xac   :  { %v365_v62 = vmax.f32 %v108_v60, 1.0  ;;  %vm349_vm6 = vcmp.gt.f32.partialorder %v108_v60, 0.0 }
  0xad   :  { %v114_v61 = vpop.xlane.xlu1 %113 }
  0xae   :  { %1045 = vrcp.f32 %v365_v62  ;;  %v367_v3 = vmax.f32 %v114_v61, 1.0  ;;  %vm351_vm9 = vcmp.gt.f32.partialorder %v114_v61, 0.0 }
  0xaf   :  { %v1267_v63 = vpop.xlane.xlu0 %116  ;;  %1047 = vrcp.f32 %v364_v0 }
  0xb0   :  { %1049 = vrcp.f32 %v367_v3  ;;  %v368_v7 = vmax.f32 %v1267_v63, 1.0  ;;  %vm352_vm12 = vcmp.gt.f32.partialorder %v1267_v63, 0.0 }
  0xb1   :  { %v1269_v2 = vpop.xlane.xlu1 %119  ;;  %1051 = vrcp.f32 %v366_v4 }
  0xb2   :  { %v369_v5 = vmax.f32 %v1269_v2, 1.0  ;;  %vm353_vm11 = vcmp.gt.f32.partialorder %v1269_v2, 0.0 }
  0xb3   :  { %v1273_v6 = vpop.xlane.xlu0 %122 }
  0xb4   :  { %1053 = vrcp.f32 %v369_v5  ;;  %v370_v11 = vmax.f32 %v1273_v6, 1.0  ;;  %vm354_vm14 = vcmp.gt.f32.partialorder %v1273_v6, 0.0 }
  0xb5   :  { %v1276_v8 = vpop.xlane.xlu1 %125  ;;  %1055 = vrcp.f32 %v368_v7 }
  0xb6   :  { %v371_v9 = vmax.f32 %v1276_v8, 1.0  ;;  %vm355_vm13 = vcmp.gt.f32.partialorder %v1276_v8, 0.0 }
  0xb7   :  { %v1279_v10 = vpop.xlane.xlu0 %128 }
  0xb8   :  { %v1046_v13 = vpop.eup %1045  ;;  %v372_v14 = vmax.f32 %v1279_v10, 1.0  ;;  %1057 = vrcp.f32 %v371_v9  ;;  %vm356_vm15 = vcmp.gt.f32.partialorder %v1279_v10, 0.0 }
  0xb9   :  { %v1282_v12 = vpop.xlane.xlu1 %131  ;;  %v1048_v18 = vpop.eup %1047  ;;  %1059 = vrcp.f32 %v370_v11 }
  0xba   :  { %v373_v16 = vmax.f32 %v1282_v12, 1.0  ;;  %v1050_v22 = vpop.eup %1049  ;;  %1061 = vrcp.f32 %v372_v14  ;;  %vm357_vm0 = vcmp.gt.f32.partialorder %v1282_v12, 0.0 }
  0xbb   :  { %v1286_v17 = vpop.xlane.xlu0 %134  ;;  %v1052_v24 = vpop.eup %1051 }
  0xbc   :  { %1063 = vrcp.f32 %v373_v16  ;;  %v374_v36 = vmax.f32 %v1286_v17, 1.0  ;;  %vm358_vm2 = vcmp.gt.f32.partialorder %v1286_v17, 0.0 }
  0xbd   :  { %v1288_v21 = vpop.xlane.xlu1 %137 }
  0xbe   :  { %v375_v30 = vmax.f32 %v1288_v21, 1.0  ;;  %v1054_v38 = vpop.eup %1053  ;;  %vm359_vm1 = vcmp.gt.f32.partialorder %v1288_v21, 0.0 }
  0xbf   :  { %v1297_v31 = vpop.xlane.xlu0 %140  ;;  %v1056_v40 = vpop.eup %1055 }
  0xc0   :  { %v376_v43 = vmax.f32 %v1297_v31, 1.0  ;;  %1065 = vrcp.f32 %v375_v30  ;;  %vm360_vm5 = vcmp.gt.f32.partialorder %v1297_v31, 0.0 }
  0xc1   :  { %v1300_v37 = vpop.xlane.xlu1 %143  ;;  %1067 = vrcp.f32 %v374_v36 }
  0xc2   :  { %v377_v47 = vmax.f32 %v1300_v37, 1.0  ;;  %v1058_v53 = vpop.eup %1057  ;;  %1069 = vrcp.f32 %v376_v43  ;;  %vm361_vm4 = vcmp.gt.f32.partialorder %v1300_v37, 0.0 }
  0xc3   :  { %v1315_v57 = vpop.xlane.xlu0 %146  ;;  %v1060_v58 = vpop.eup %1059 }
  0xc4   :  { %1071 = vrcp.f32 %v377_v47  ;;  %v1062_v2 = vpop.eup %1061  ;;  %v378_v9 = vmax.f32 %v1315_v57, 1.0 }
  0xc5   :  { %v1310_v52 = vpop.xlane.xlu1 %149 }
  0xc6   :  { %v379_v3 = vmax.f32 %v1310_v52, 1.0  ;;  %v1064_v11 = vpop.eup %1063 }
  0xc8   :  { %1073 = vrcp.f32 %v379_v3 }
  0xc9   :  { %1075 = vrcp.f32 %v378_v9 }
  0xee   :  { %v874_v15 = vpop.f32.mrb[0].mxu0 }
  0xef   :  { %v383_v19 = vmul.f32 %v1046_v13, %v874_v15  ;;  %v269_v20 = vpop.f32.mrb[1].mxu0 }
  0xf0   :  { %v381_v23 = vmul.f32 %v1048_v18, %v269_v20 }
  0xf1   :  { %v445_v25 = vsel %vm349_vm6, %v383_v19, 0.0  ;;  %vm363_vm6 = vcmp.gt.f32.partialorder %v1310_v52, 0.0 }
  0xf2   :  { %v466_v26 = vmul.f32 %v445_v25, %v445_v25  ;;  %v444_v27 = vsel %vm348_vm7, %v381_v23, 0.0  ;;  %v877_v28 = vpop.f32.mrb[2].mxu0  ;;  %v1066_v23 = vpop.eup %1065  ;;  %vm362_vm7 = vcmp.gt.f32.partialorder %v1315_v57, 0.0 }
  0xf3   :  { %v465_v32 = vmul.f32 %v444_v27, %v444_v27  ;;  %v1005_v33 = vpack.c.bf16 %v445_v25, %v444_v27  ;;  %v387_v34 = vmul.f32 %v1050_v22, %v877_v28  ;;  %v279_v35 = vpop.f32.mrb[3].mxu0  ;;  %v1068_v25 = vpop.eup %1067 }
  0xf4   :  { %v385_v39 = vmul.f32 %v1052_v24, %v279_v35 }
  0xf5   :  { %v447_v41 = vsel %vm351_vm9, %v387_v34, 0.0  ;;  %1007 = vmatpush3.bf16.xpose.msk.msra.mxu0 %vm1292_vm8, %v1005_v33  ;;  %v973_v42 = vpack.c.bf16 %v466_v26, %v465_v32  ;;  %v1070_v33 = vpop.eup %1069 }
  0xf6   :  { %v468_v44 = vmul.f32 %v447_v41, %v447_v41  ;;  %v446_v45 = vsel %vm350_vm10, %v385_v39, 0.0  ;;  %v880_v46 = vpop.f32.mrb[4].mxu0  ;;  %1008 = vmatprep.subr.bf16.mxu0 %v1130_v54  ;;  %v1072_v39 = vpop.eup %1071 }
  0xf7   :  { %v467_v48 = vmul.f32 %v446_v45, %v446_v45  ;;  %v1009_v49 = vpack.c.bf16 %v447_v41, %v446_v45  ;;  %v391_v50 = vmul.f32 %v1054_v38, %v880_v46  ;;  %v289_v51 = vpop.f32.mrb[5].mxu0  ;;  %975 = vmatpush3.bf16.xpose.msk.msra.mxu1 %vm1292_vm8, %v973_v42  ;;  %v1074_v46 = vpop.eup %1073 }
  0xf8   :  { %v389_v56 = vmul.f32 %v1056_v40, %v289_v51  ;;  %976 = vmatprep.subr.bf16.mxu1 %v1130_v54 }
  0xf9   :  { %v977_v59 = vpack.c.bf16 %v468_v44, %v467_v48  ;;  %v449_v60 = vsel %vm353_vm11, %v391_v50, 0.0  ;;  %v1076_v48 = vpop.eup %1075 }
  0xfa   :  { %v470_v61 = vmul.f32 %v449_v60, %v449_v60  ;;  %v448_v62 = vsel %vm352_vm12, %v389_v56, 0.0  ;;  %v883_v0 = vpop.f32.mrb[6].mxu0 }
  0xfb   :  { %v469_v4 = vmul.f32 %v448_v62, %v448_v62  ;;  %v1013_v63 = vpack.c.bf16 %v449_v60, %v448_v62  ;;  %v395_v5 = vmul.f32 %v1058_v53, %v883_v0  ;;  %v299_v7 = vpop.f32.mrb[7].mxu0 }
  0xfc   :  { %v393_v13 = vmul.f32 %v1060_v58, %v299_v7 }
  0xfd   :  { %v981_v14 = vpack.c.bf16 %v470_v61, %v469_v4  ;;  %v1324_v15 = vsel %vm355_vm13, %v395_v5, 0.0  ;;  %1011 = vmatpush3.bf16.xpose.msk.msra.mxu0 %vm1292_vm8, %v1009_v49  ;;  %v1132_v4 = vmov 1.0  }
  0xfe   :  { %v1331_v16 = vmul.f32 %v1324_v15, %v1324_v15  ;;  %v450_v18 = vsel %vm354_vm14, %v393_v13, 0.0  ;;  %v886_v19 = vpop.f32.mrb[8].mxu0  ;;  %1012 = vmatprep.subr.bf16.mxu0 %v1130_v54 }
  0xff   :  { %v471_v6 = vmul.f32 %v450_v18, %v450_v18  ;;  %v1017_v20 = vpack.c.bf16 %v1324_v15, %v450_v18  ;;  %979 = vmatpush3.bf16.xpose.msk.msra.mxu1 %vm1292_vm8, %v977_v59  ;;  %v399_v8 = vmul.f32 %v1064_v11, %v886_v19  ;;  %v309_v22 = vpop.f32.mrb[9].mxu0  ;;  %v464_v11 = vpop.xlane.xlu0 %463 }
 0x100   :  { %v397_v24 = vmul.f32 %v1062_v2, %v309_v22  ;;  %980 = vmatprep.subr.bf16.mxu1 %v1130_v54 }
 0x101   :  { %v985_v26 = vpack.c.bf16 %v1331_v16, %v471_v6  ;;  %v453_v27 = vsel %vm357_vm0, %v399_v8, 0.0 }
 0x102   :  { %v474_v28 = vmul.f32 %v453_v27, %v453_v27  ;;  %v452_v30 = vsel %vm356_vm15, %v397_v24, 0.0  ;;  %v889_v32 = vpop.f32.mrb[10].mxu0 }
 0x103   :  { %v473_v34 = vmul.f32 %v452_v30, %v452_v30  ;;  %v1021_v35 = vpack.c.bf16 %v453_v27, %v452_v30  ;;  %v403_v36 = vmul.f32 %v1066_v23, %v889_v32  ;;  %v319_v38 = vpop.f32.mrb[11].mxu0 }
 0x104   :  { %v401_v40 = vmul.f32 %v1068_v25, %v319_v38 }
 0x105   :  { %v989_v41 = vpack.c.bf16 %v474_v28, %v473_v34  ;;  %1015 = vmatpush3.bf16.xpose.msk.msra.mxu0 %vm1292_vm8, %v1013_v63  ;;  %v455_v12 = vsel %vm359_vm1, %v403_v36, 0.0  ;;  %v725_v63 = vsub.s32 0, %v1166_v1 }
 0x106   :  { %v476_v21 = vmul.f32 %v455_v12, %v455_v12  ;;  %v454_v10 = vsel %vm358_vm2, %v401_v40, 0.0  ;;  %1016 = vmatprep.subr.bf16.mxu0 %v1130_v54  ;;  %v892_v42 = vpop.f32.mrb[12].mxu0 }
 0x107   :  { %983 = vmatpush3.bf16.xpose.msk.msra.mxu1 %vm1292_vm8, %v981_v14  ;;  %v475_v17 = vmul.f32 %v454_v10, %v454_v10  ;;  %v1025_v43 = vpack.c.bf16 %v455_v12, %v454_v10  ;;  %v407_v44 = vmul.f32 %v1072_v39, %v892_v42  ;;  %v329_v45 = vpop.f32.mrb[13].mxu0 }
 0x108   :  { %984 = vmatprep.subr.bf16.mxu1 %v1130_v54  ;;  %v405_v47 = vmul.f32 %v1070_v33, %v329_v45 }
 0x109   :  { %v993_v49 = vpack.c.bf16 %v476_v21, %v475_v17  ;;  %v457_v50 = vsel %vm361_vm4, %v407_v44, 0.0 }
 0x10a   :  { %v478_v51 = vmul.f32 %v457_v50, %v457_v50  ;;  %v456_v31 = vsel %vm360_vm5, %v405_v47, 0.0  ;;  %v895_v53 = vpop.f32.mrb[14].mxu0 }
 0x10b   :  { %v477_v56 = vmul.f32 %v456_v31, %v456_v31  ;;  %v1029_v58 = vpack.c.bf16 %v457_v50, %v456_v31  ;;  %v411_v59 = vmul.f32 %v1074_v46, %v895_v53  ;;  %v339_v60 = vpop.f32.mrb[15].mxu0 }
 0x10c   :  { %v409_v61 = vmul.f32 %v1076_v48, %v339_v60 }
 0x10d   :  { %1019 = vmatpush3.bf16.xpose.msk.msra.mxu0 %vm1292_vm8, %v1017_v20  ;;  %v997_v62 = vpack.c.bf16 %v478_v51, %v477_v56  ;;  %v459_v0 = vsel %vm363_vm6, %v411_v59, 0.0 }
 0x10e   :  { %1020 = vmatprep.subr.bf16.mxu0 %v1130_v54  ;;  %v480_v37 = vmul.f32 %v459_v0, %v459_v0  ;;  %v458_v3 = vsel %vm362_vm7, %v409_v61, 0.0 }
 0x10f   :  { %987 = vmatpush3.bf16.xpose.msk.msra.mxu1 %vm1292_vm8, %v985_v26  ;;  %v479_v52 = vmul.f32 %v458_v3, %v458_v3  ;;  %v1033_v2 = vpack.c.bf16 %v459_v0, %v458_v3 }
 0x110   :  { %988 = vmatprep.subr.bf16.mxu1 %v1130_v54 }
 0x111   :  { %v1001_v57 = vpack.c.bf16 %v480_v37, %v479_v52 }
 0x115   :  { %1023 = vmatpush3.bf16.xpose.msk.msra.mxu0 %vm1292_vm8, %v1021_v35 }
 0x116   :  { %1024 = vmatprep.subr.bf16.mxu0 %v1130_v54 }
 0x117   :  { %991 = vmatpush3.bf16.xpose.msk.msra.mxu1 %vm1292_vm8, %v989_v41 }
 0x118   :  { %992 = vmatprep.subr.bf16.mxu1 %v1130_v54 }
 0x11d   :  { %1027 = vmatpush3.bf16.xpose.msk.msra.mxu0 %vm1292_vm8, %v1025_v43 }
 0x11e   :  { %1028 = vmatprep.subr.bf16.mxu0 %v1130_v54 }
 0x11f   :  { %995 = vmatpush3.bf16.xpose.msk.msra.mxu1 %vm1292_vm8, %v993_v49 }
 0x120   :  { %996 = vmatprep.subr.bf16.mxu1 %v1130_v54 }
 0x125   :  { %1031 = vmatpush3.bf16.xpose.msk.msra.mxu0 %vm1292_vm8, %v1029_v58 }
 0x126   :  { %1032 = vmatprep.subr.bf16.mxu0 %v1130_v54 }
 0x127   :  { %999 = vmatpush3.bf16.xpose.msk.msra.mxu1 %vm1292_vm8, %v997_v62 }
 0x128   :  { %1000 = vmatprep.subr.bf16.mxu1 %v1130_v54 }
 0x12d   :  { %1035 = vmatpush3.bf16.xpose.msk.msra.mxu0 %vm1292_vm8, %v1033_v2 }
 0x12f   :  { %1003 = vmatpush3.bf16.xpose.msk.msra.mxu1 %vm1292_vm8, %v1001_v57 }
 0x134   :  { %964 = vmatmul.mubr.msk.f32.vlgmr.msra.gmra.mrb[16].mxu0 %vm461_vm3, %v1260_v55 }
 0x136   :  { %929 = vmatmul.mubr.msk.f32.vlgmr.msra.gmra.mrb[0].mxu1 %vm461_vm3, %v1132_v4 }
 0x207   :  { %v719_v5 = vpop.f32.mrb[16].mxu0 }
 0x208   :  { %v965_v7 = vpop.f32.mrb[17].mxu0  ;;  %v728_v14 = vmul.f32 2.0, %v719_v5 }
 0x209   :  { %v598_v9 = vpop.f32.mrb[0].mxu1 }
 0x20a   :  { %v726_v13 = vrot.slane %v598_v9, %v725_v63  ;;  %v930_v54 = vpop.f32.mrb[1].mxu1 }
 0x20c   :  { %v727_v15 = vadd.f32 %v726_v13, %v464_v11 }
 0x20e   :  { %v729_v16 = vsub.f32 %v727_v15, %v728_v14 }
 0x210   :  { %v730_v29 = vmax.f32 %v729_v16, 0.0 }
 0x212   :  { %v731_v18 = vsub.f32 0.0, %v730_v29 }
 0x214   :  { %732 = vst [vmem:[#allocation5] sm:$0xff] %v731_v18 }
 0x215   :  { %1110 = shalt.err (!%p1107_p12)
}
 0x216   :  { %s1111_s5 = scalar_lea.hbm %s1404_s3, 128 }
 0x217   :  { %p1112_p13 = scmp.ne.s32.totalorder %s1404_s3, %s1111_s5  ;;  %p1115_p0 = scmp.lt.u32.totalorder %s1111_s5, %s1404_s3 }
 0x219   :  { %p1117_p1 = pnand %p1115_p0, %p1112_p13 }
 0x21b   :  { %1120 = shalt.err (!%p1117_p1)
}
 0x21c   :  { %742 = dma.vmem_to_hbm [thread:$0]  %s740_s28, 128, %s1404_s3, [#allocation4]  }
 0x21d   :  { %1123 = dma.done.wait [#allocation4], 128  }
 0x21e   :  { %1124 = vsyncadd [#allocation4], 4294967168 }
 0x21f   :  { %746 = vsyncpa [#allocation3], 1 }
 0x220   :  { %747 = vsyncpa [#allocation4], 1 }

</bundles_post_ra>
